<compile_context>
chip_gen: v5e
topology: v5e:2x2
jax: 0.10.0
libtpu: 0.0.40
codegen_flags: <defaults>
</compile_context>

<pallas_src>
import jax
import jax.numpy as jnp
from jax.experimental import pallas as pl
from jax.experimental.pallas import tpu as pltpu

_LANES = 128
_SUBLANES_F32 = 8
_ROW_ALIGN = 16           # bf16 label blocks need sublane counts that are multiples of 16


def _cdiv(a, b):
    return -(-a // b)


def _round_up(a, b):
    return _cdiv(a, b) * b


def _chip_config():
    """Best-effort chip detection -> (num_parallel_tensorcores, max_tile_rows)."""
    kind = ""
    try:
        kind = jax.devices()[0].device_kind.lower()
    except Exception:
        pass
    if "v7" in kind:
        # 2 TensorCores/chip; 8192x128 tiles (4 MiB f32 + 2 MiB bf16, ~12 MiB
        # double-buffered) amortize per-step overhead against 3.2 TB/s HBM and
        # stay well inside the 32 MiB default scoped VMEM.
        return 2, 8192
    # v5e / v6e: single TensorCore.  2048x128 tiles (~3 MiB double-buffered)
    # fit comfortably under v5e's 16 MiB default scoped VMEM and already keep
    # fixed per-step overhead below ~20% of the DMA time.
    return 1, 2048


def _f1_sums_kernel(d_ref, lab_ref, st_ref, sp_ref, stp_ref):
    """Accumulate S_t, S_p, S_tp over one (tile_rows, 128) chunk of the batch."""

    @pl.when(pl.program_id(1) == 0)
    def _init():
        st_ref[...] = jnp.zeros_like(st_ref)
        sp_ref[...] = jnp.zeros_like(sp_ref)
        stp_ref[...] = jnp.zeros_like(stp_ref)

    d = d_ref[...]                             # (T, 128) f32 logit margins z1 - z0
    lab = lab_ref[...]                         # (T, 128) bf16 labels in {0, 1}
    p1 = jax.nn.sigmoid(d)                     # == softmax([z0, z1], axis=-1)[1]
    t = lab.astype(jnp.float32)
    tp = jnp.where(lab != 0, p1, 0.0)          # t * p1 without the extra multiply

    # (T,128) -> (T//8, 8, 128): the axis-0 sum is pure vreg adds producing an
    # (8,128) partial; the sublane/lane collapse happens once in the epilogue.
    st_ref[...] += jnp.sum(t.reshape(-1, _SUBLANES_F32, _LANES), axis=0)[None]
    sp_ref[...] += jnp.sum(p1.reshape(-1, _SUBLANES_F32, _LANES), axis=0)[None]
    stp_ref[...] += jnp.sum(tp.reshape(-1, _SUBLANES_F32, _LANES), axis=0)[None]


def f1_loss(y_pred, y_true, epsilon=1e-07):
    """Pallas TPU implementation of F1_Loss.forward."""
    assert y_pred.ndim == 2
    assert y_true.ndim == 1
    n, c = y_pred.shape
    assert c == 2, "reference module one-hots with exactly 2 classes"
    assert y_true.shape[0] == n

    num_parallel, max_tile_rows = _chip_config()

    # ---- lane-dense layout --------------------------------------------------
    rows = _cdiv(n, _LANES)
    rows_per_slice = _cdiv(rows, num_parallel)
    tile_rows = min(max_tile_rows, _round_up(rows_per_slice, _ROW_ALIGN))
    tiles_per_slice = _cdiv(rows, num_parallel * tile_rows)
    total_rows = num_parallel * tiles_per_slice * tile_rows
    pad = total_rows * _LANES - n

    # softmax over 2 classes == sigmoid(z1 - z0); the subtract/pad/reshape and
    # the label cast/pad/reshape each fuse into a single XLA pass, and halve /
    # quarter the bytes the kernel has to stream per sample.
    margin = (y_pred[:, 1] - y_pred[:, 0]).astype(jnp.float32)
    margin = jnp.pad(margin, (0, pad), constant_values=-30000.0)     # sigmoid -> 0
    labels = jnp.pad(y_true, (0, pad)).astype(jnp.bfloat16)          # padded t -> 0
    margin2d = margin.reshape(total_rows, _LANES)
    labels2d = labels.reshape(total_rows, _LANES)

    part_shape = jax.ShapeDtypeStruct(
        (num_parallel, _SUBLANES_F32, _LANES), jnp.float32)
    in_map = lambda p, i: (p * tiles_per_slice + i, 0)
    out_map = lambda p, i: (p, 0, 0)

    st, sp, stp = pl.pallas_call(
        _f1_sums_kernel,
        out_shape=(part_shape, part_shape, part_shape),
        grid_spec=pltpu.PrefetchScalarGridSpec(
            num_scalar_prefetch=0,
            grid=(num_parallel, tiles_per_slice),
            in_specs=[
                pl.BlockSpec((tile_rows, _LANES), in_map),
                pl.BlockSpec((tile_rows, _LANES), in_map),
            ],
            out_specs=[
                pl.BlockSpec((1, _SUBLANES_F32, _LANES), out_map),
                pl.BlockSpec((1, _SUBLANES_F32, _LANES), out_map),
                pl.BlockSpec((1, _SUBLANES_F32, _LANES), out_map),
            ],
        ),
        compiler_params=pltpu.CompilerParams(
            dimension_semantics=("parallel", "arbitrary"),
        ),
    )(margin2d, labels2d)

    # ---- O(1) epilogue: combine per-core/sublane/lane partials, finish F1 ---
    s_t = jnp.sum(st)      # sum of class-1 one-hot labels
    s_p = jnp.sum(sp)      # sum of predicted class-1 probabilities
    s_tp = jnp.sum(stp)    # sum of label * prob for class 1
    n_f = jnp.float32(n)

    tp = jnp.stack([n_f - s_t - s_p + s_tp, s_tp])   # classes [0, 1]
    fp = jnp.stack([s_t - s_tp, s_p - s_tp])
    fn = jnp.stack([s_p - s_tp, s_t - s_tp])

    precision = tp / (tp + fp + epsilon)
    recall = tp / (tp + fn + epsilon)
    f1 = 2.0 * precision * recall / (precision + recall + epsilon)
    f1 = jnp.clip(f1, epsilon, 1.0 - epsilon)
    return 1.0 - jnp.mean(f1)


def _f1_loss_ref(y_pred, y_true, epsilon=1e-07):
    """Pure-JAX reference mirroring the PyTorch forward, for verification."""
    y_true_oh = jax.nn.one_hot(y_true, 2, dtype=jnp.float32)
    y_prob = jax.nn.softmax(y_pred.astype(jnp.float32), axis=1)
    tp = jnp.sum(y_true_oh * y_prob, axis=0)
    fp = jnp.sum((1.0 - y_true_oh) * y_prob, axis=0)
    fn = jnp.sum(y_true_oh * (1.0 - y_prob), axis=0)
    precision = tp / (tp + fp + epsilon)
    recall = tp / (tp + fn + epsilon)
    f1 = 2.0 * (precision * recall) / (precision + recall + epsilon)
    f1 = jnp.clip(f1, epsilon, 1.0 - epsilon)
    return 1.0 - jnp.mean(f1)


if __name__ == "__main__":
    key = jax.random.PRNGKey(0)
    k_pred, k_true = jax.random.split(key)

    N, C = 300, 2  # small batch, not a multiple of 128 -> exercises padding path
    y_pred = jax.random.normal(k_pred, (N, C), dtype=jnp.float32)
    y_true = jax.random.randint(k_true, (N,), 0, C, dtype=jnp.int32)

    loss = jax.block_until_ready(f1_loss(y_pred, y_true))
    ref = jax.block_until_ready(_f1_loss_ref(y_pred, y_true))

    assert jnp.allclose(loss, ref, atol=1e-5, rtol=1e-5), (loss, ref)
    print("KERNEL_OK")
</pallas_src>

<mosaic_0001>
module attributes {stable_mosaic.version = 11 : i64} {
  func.func @_f1_sums_kernel(%arg0: i32, %arg1: i32, %arg2: memref<16x128xf32, #tpu.memory_space<vmem>>, %arg3: memref<16x128xbf16, #tpu.memory_space<vmem>>, %arg4: memref<1x8x128xf32, #tpu.memory_space<vmem>>, %arg5: memref<1x8x128xf32, #tpu.memory_space<vmem>>, %arg6: memref<1x8x128xf32, #tpu.memory_space<vmem>>) attributes {dimension_semantics = [#tpu.dimension_semantics<parallel>, #tpu.dimension_semantics<arbitrary>], iteration_bounds = array<i64: 1, 1>, scalar_prefetch = 0 : i64, scratch_operands = 0 : i64, tpu.core_type = #tpu.core_type<tc>, window_params = [{transform_indices = @transform_0, window_bounds = array<i64: 16, 128>}, {transform_indices = @transform_1, window_bounds = array<i64: 16, 128>}, {transform_indices = @transform_2, window_bounds = array<i64: 1, 8, 128>}, {transform_indices = @transform_3, window_bounds = array<i64: 1, 8, 128>}, {transform_indices = @transform_4, window_bounds = array<i64: 1, 8, 128>}]} {
    %c0_i32 = arith.constant 0 : i32
    %0 = arith.cmpi eq, %arg1, %c0_i32 : i32
    %1 = arith.extui %0 : i1 to i32
    %c0_i32_0 = arith.constant 0 : i32
    %2 = arith.cmpi ne, %1, %c0_i32_0 : i32
    scf.if %2 {
      %cst_27 = arith.constant 0.000000e+00 : f32
      %33 = vector.broadcast %cst_27 : f32 to vector<1x8x128xf32>
      %c0_28 = arith.constant 0 : index
      %c0_29 = arith.constant 0 : index
      %c0_30 = arith.constant 0 : index
      %34 = vector.load %arg4[%c0_28, %c0_29, %c0_30] : memref<1x8x128xf32, #tpu.memory_space<vmem>>, vector<1x8x128xf32>
      tpu.vector_store %arg4[%c0_28, %c0_29, %c0_30], %33 {strides = array<i32>} : memref<1x8x128xf32, #tpu.memory_space<vmem>>, vector<1x8x128xf32>,
      %cst_31 = arith.constant 0.000000e+00 : f32
      %35 = vector.broadcast %cst_31 : f32 to vector<1x8x128xf32>
      %c0_32 = arith.constant 0 : index
      %c0_33 = arith.constant 0 : index
      %c0_34 = arith.constant 0 : index
      %36 = vector.load %arg5[%c0_32, %c0_33, %c0_34] : memref<1x8x128xf32, #tpu.memory_space<vmem>>, vector<1x8x128xf32>
      tpu.vector_store %arg5[%c0_32, %c0_33, %c0_34], %35 {strides = array<i32>} : memref<1x8x128xf32, #tpu.memory_space<vmem>>, vector<1x8x128xf32>,
      %cst_35 = arith.constant 0.000000e+00 : f32
      %37 = vector.broadcast %cst_35 : f32 to vector<1x8x128xf32>
      %c0_36 = arith.constant 0 : index
      %c0_37 = arith.constant 0 : index
      %c0_38 = arith.constant 0 : index
      %38 = vector.load %arg6[%c0_36, %c0_37, %c0_38] : memref<1x8x128xf32, #tpu.memory_space<vmem>>, vector<1x8x128xf32>
      tpu.vector_store %arg6[%c0_36, %c0_37, %c0_38], %37 {strides = array<i32>} : memref<1x8x128xf32, #tpu.memory_space<vmem>>, vector<1x8x128xf32>,
    } else {
    }
    %c0 = arith.constant 0 : index
    %c0_1 = arith.constant 0 : index
    %3 = vector.load %arg2[%c0, %c0_1] : memref<16x128xf32, #tpu.memory_space<vmem>>, vector<16x128xf32>
    %c0_2 = arith.constant 0 : index
    %c0_3 = arith.constant 0 : index
    %4 = vector.load %arg3[%c0_2, %c0_3] : memref<16x128xbf16, #tpu.memory_space<vmem>>, vector<16x128xbf16>
    %5 = arith.negf %3 : vector<16x128xf32>
    %6 = math.exp %5 : vector<16x128xf32>
    %cst = arith.constant 1.000000e+00 : f32
    %7 = vector.broadcast %cst : f32 to vector<16x128xf32>
    %8 = arith.addf %7, %6 : vector<16x128xf32>
    %9 = arith.divf %7, %8 : vector<16x128xf32>
    %10 = arith.extf %4 : vector<16x128xbf16> to vector<16x128xf32>
    %cst_4 = arith.constant 0.000000e+00 : bf16
    %11 = vector.broadcast %cst_4 : bf16 to vector<16x128xbf16>
    %12 = arith.cmpf one, %4, %11 : vector<16x128xbf16>
    %cst_5 = arith.constant 0.000000e+00 : f32
    %13 = vector.broadcast %cst_5 : f32 to vector<16x128xf32>
    %14 = arith.select %12, %9, %13 : vector<16x128xi1>, vector<16x128xf32>
    %c0_6 = arith.constant 0 : index
    %c0_7 = arith.constant 0 : index
    %c0_8 = arith.constant 0 : index
    %15 = vector.load %arg4[%c0_6, %c0_7, %c0_8] : memref<1x8x128xf32, #tpu.memory_space<vmem>>, vector<1x8x128xf32>
    %16 = vector.shape_cast %10 : vector<16x128xf32> to vector<2x8x128xf32>
    %cst_9 = arith.constant dense<0.000000e+00> : vector<8x128xf32>
    %17 = vector.multi_reduction <add>, %16, %cst_9 [0] : vector<2x8x128xf32> to vector<8x128xf32>
    %18 = vector.shape_cast %17 : vector<8x128xf32> to vector<1x8x128xf32>
    %19 = arith.addf %15, %18 : vector<1x8x128xf32>
    %c0_10 = arith.constant 0 : index
    %c0_11 = arith.constant 0 : index
    %c0_12 = arith.constant 0 : index
    %20 = vector.load %arg4[%c0_10, %c0_11, %c0_12] : memref<1x8x128xf32, #tpu.memory_space<vmem>>, vector<1x8x128xf32>
    tpu.vector_store %arg4[%c0_10, %c0_11, %c0_12], %19 {strides = array<i32>} : memref<1x8x128xf32, #tpu.memory_space<vmem>>, vector<1x8x128xf32>,
    %c0_13 = arith.constant 0 : index
    %c0_14 = arith.constant 0 : index
    %c0_15 = arith.constant 0 : index
    %21 = vector.load %arg5[%c0_13, %c0_14, %c0_15] : memref<1x8x128xf32, #tpu.memory_space<vmem>>, vector<1x8x128xf32>
    %22 = vector.shape_cast %9 : vector<16x128xf32> to vector<2x8x128xf32>
    %cst_16 = arith.constant dense<0.000000e+00> : vector<8x128xf32>
    %23 = vector.multi_reduction <add>, %22, %cst_16 [0] : vector<2x8x128xf32> to vector<8x128xf32>
    %24 = vector.shape_cast %23 : vector<8x128xf32> to vector<1x8x128xf32>
    %25 = arith.addf %21, %24 : vector<1x8x128xf32>
    %c0_17 = arith.constant 0 : index
    %c0_18 = arith.constant 0 : index
    %c0_19 = arith.constant 0 : index
    %26 = vector.load %arg5[%c0_17, %c0_18, %c0_19] : memref<1x8x128xf32, #tpu.memory_space<vmem>>, vector<1x8x128xf32>
    tpu.vector_store %arg5[%c0_17, %c0_18, %c0_19], %25 {strides = array<i32>} : memref<1x8x128xf32, #tpu.memory_space<vmem>>, vector<1x8x128xf32>,
    %c0_20 = arith.constant 0 : index
    %c0_21 = arith.constant 0 : index
    %c0_22 = arith.constant 0 : index
    %27 = vector.load %arg6[%c0_20, %c0_21, %c0_22] : memref<1x8x128xf32, #tpu.memory_space<vmem>>, vector<1x8x128xf32>
    %28 = vector.shape_cast %14 : vector<16x128xf32> to vector<2x8x128xf32>
    %cst_23 = arith.constant dense<0.000000e+00> : vector<8x128xf32>
    %29 = vector.multi_reduction <add>, %28, %cst_23 [0] : vector<2x8x128xf32> to vector<8x128xf32>
    %30 = vector.shape_cast %29 : vector<8x128xf32> to vector<1x8x128xf32>
    %31 = arith.addf %27, %30 : vector<1x8x128xf32>
    %c0_24 = arith.constant 0 : index
    %c0_25 = arith.constant 0 : index
    %c0_26 = arith.constant 0 : index
    %32 = vector.load %arg6[%c0_24, %c0_25, %c0_26] : memref<1x8x128xf32, #tpu.memory_space<vmem>>, vector<1x8x128xf32>
    tpu.vector_store %arg6[%c0_24, %c0_25, %c0_26], %31 {strides = array<i32>} : memref<1x8x128xf32, #tpu.memory_space<vmem>>, vector<1x8x128xf32>,
    return
  }
  func.func @transform_0(%arg0: i32, %arg1: i32) -> (i32, i32) {
    %c1_i32 = arith.constant 1 : i32
    %0 = arith.muli %arg0, %c1_i32 : i32
    %1 = arith.addi %0, %arg1 : i32
    %c0_i32 = arith.constant 0 : i32
    %c0_i32_0 = arith.constant 0 : i32
    return %1, %c0_i32 : i32, i32
  }
  func.func @transform_1(%arg0: i32, %arg1: i32) -> (i32, i32) {
    %c1_i32 = arith.constant 1 : i32
    %0 = arith.muli %arg0, %c1_i32 : i32
    %1 = arith.addi %0, %arg1 : i32
    %c0_i32 = arith.constant 0 : i32
    %c0_i32_0 = arith.constant 0 : i32
    return %1, %c0_i32 : i32, i32
  }
  func.func @transform_2(%arg0: i32, %arg1: i32) -> (i32, i32, i32) {
    %c0_i32 = arith.constant 0 : i32
    %c0_i32_0 = arith.constant 0 : i32
    %c0_i32_1 = arith.constant 0 : i32
    return %arg0, %c0_i32, %c0_i32_0 : i32, i32, i32
  }
  func.func @transform_3(%arg0: i32, %arg1: i32) -> (i32, i32, i32) {
    %c0_i32 = arith.constant 0 : i32
    %c0_i32_0 = arith.constant 0 : i32
    %c0_i32_1 = arith.constant 0 : i32
    return %arg0, %c0_i32, %c0_i32_0 : i32, i32, i32
  }
  func.func @transform_4(%arg0: i32, %arg1: i32) -> (i32, i32, i32) {
    %c0_i32 = arith.constant 0 : i32
    %c0_i32_0 = arith.constant 0 : i32
    %c0_i32_1 = arith.constant 0 : i32
    return %arg0, %c0_i32, %c0_i32_0 : i32, i32, i32
  }
}

</mosaic_0001>

<bundles_post_ra>
// kernel: tpu_custom_call.1
= control target key start
LH: loop header
LB: loop body
LE: loop exit
PB: predicated region body
PF: predicated region fallthrough
CT: control target
= control target key end

     0   :  { %10 = vsyncpa [#allocation3], 0  ;;  %s377_s0 = inlined_call_operand.hbm [shape: f32[16,128], index: 0, kind: input, shape index: {}]   ;;  %s378_s1 = inlined_call_operand.hbm [shape: bf16[16,128], index: 1, kind: input, shape index: {}]   ;;  %s379_s2 = inlined_call_operand.hbm [shape: f32[1,8,128], index: 2, kind: output, shape index: {0}]   ;;  %s380_s3 = inlined_call_operand.hbm [shape: f32[1,8,128], index: 3, kind: output, shape index: {1}]   ;;  %s381_s4 = inlined_call_operand.hbm [shape: f32[1,8,128], index: 4, kind: output, shape index: {2}]  }
   0x1   :  { %11 = vsyncpa [#allocation6], 0 }
   0x2   :  { %12 = vsyncpa [#allocation4], 0 }
   0x3   :  { %13 = vsyncpa [#allocation9], 0  ;;  %s22_s17 = sshll.u32 %s377_s0, 4  ;;  %s328_s18 = smov [#allocation2]   ;;  %s23_s17 = int_to_ptr.hbm [resolvable:$true] %s22_s17 }
   0x4   :  { %s24_s19 = sshll.u32 %s328_s18, 4  ;;  %s39_s22 = sshll.u32 %s378_s1, 4  ;;  %s25_s19 = int_to_ptr.vmem [resolvable:$true] %s24_s19  ;;  %s40_s22 = int_to_ptr.hbm [resolvable:$true] %s39_s22 }
   0x5   :  { %s329_s23 = smov 128   ;;  %s330_s24 = smov 8  }
   0x6   :  { %30 = dma.hbm_to_vmem [thread:$0]  %s23_s17, 256, %s25_s19, [#allocation3], %s329_s23, %s329_s23, %s330_s24  }
   0x7   :  { %s331_s25 = smov [#allocation5]   ;;  %s332_s27 = smov 64  }
   0x8   :  { %s41_s26 = sshll.u32 %s331_s25, 4  ;;  %s333_s28 = smov 4   ;;  %s42_s26 = int_to_ptr.vmem [resolvable:$true] %s41_s26 }
   0x9   :  { %47 = dma.hbm_to_vmem [thread:$0]  %s40_s22, 128, %s42_s26, [#allocation6], %s332_s27, %s332_s27, %s333_s28  }
   0xa   :  { %320 = dma.done.wait [#allocation3], 256  }
   0xb   :  { %321 = vsyncadd [#allocation3], 4294967040 }
   0xc   :  { %322 = dma.done.wait [#allocation6], 128  }
   0xd   :  { %323 = vsyncadd [#allocation6], 4294967168  ;;  %v67_v0 = vld [vmem:[#allocation2] sm:$0xff]  ;;  %v68_v1 = vld [vmem:[#allocation2 + $0x8] sm:$0xff]  ;;  %s334_s0 = smov [#allocation7]   ;;  %s134_s5 = sshll.u32 %s379_s2, 4  ;;  %s135_s5 = int_to_ptr.hbm [resolvable:$true] %s134_s5 }
   0xe   :  { %v179_v2 = vld [vmem:[#allocation5] sm:$0xff]   ;;  %v176_v3 = vmul.f32 -1.442695, %v67_v0  ;;  %v177_v4 = vmul.f32 -1.442695, %v68_v1  ;;  %s132_s1 = sshll.u32 %s334_s0, 4  ;;  %s133_s1 = int_to_ptr.vmem [resolvable:$true] %s132_s1 }
   0xf   :  { %v180_v5 = vunpack.c.l.bf16 %v179_v2  ;;  %v181_v6 = vunpack.c.h.bf16 %v179_v2  ;;  %s335_s2 = smov [#allocation8]   ;;  %s145_s9 = sshll.u32 %s380_s3, 4  ;;  %s146_s9 = int_to_ptr.hbm [resolvable:$true] %s145_s9 }
  0x10   :  { %192 = vpow2.f32 %v176_v3  ;;  %s143_s6 = sshll.u32 %s335_s2, 4  ;;  %s336_s10 = smov [#allocation10]   ;;  %s144_s6 = int_to_ptr.vmem [resolvable:$true] %s143_s6 }
  0x11   :  { %v116_v7 = vadd.f32 %v181_v6, %v180_v5  ;;  %194 = vpow2.f32 %v177_v4  ;;  %vm111_vm8 = vcmp.ne.f32.partialorder %v180_v5, 0.0  ;;  %vm112_vm9 = vcmp.ne.f32.partialorder %v181_v6, 0.0  ;;  %s154_s11 = sshll.u32 %s336_s10, 4  ;;  %s156_s14 = sshll.u32 %s381_s4, 4  ;;  %s155_s11 = int_to_ptr.vmem [resolvable:$true] %s154_s11  ;;  %s157_s14 = int_to_ptr.hbm [resolvable:$true] %s156_s14 }
  0x13   :  { %118 = vst [vmem:[#allocation7] sm:$0xff] %v116_v7 }
  0x14   :  { %137 = dma.vmem_to_hbm [thread:$0]  %s133_s1, 128, %s135_s5, [#allocation4]  }
  0x16   :  { %v193_v8 = vpop.eup %192 }
  0x17   :  { %v195_v9 = vpop.eup %194  ;;  %v77_v10 = vadd.f32 1.0, %v193_v8 }
  0x18   :  { %v78_v11 = vadd.f32 1.0, %v195_v9 }
  0x19   :  { %196 = vrcp.f32 %v77_v10  ;;  %vm84_vm0 = vweird.f32 %v77_v10  ;;  %v90_v15 = vand.u32 2147483648, %v77_v10  ;;  %v88_v18 = vand.u32 2147483647, %v77_v10 }
  0x1a   :  { %198 = vrcp.f32 %v78_v11  ;;  %v105_v19 = vand.u32 2147483648, %v78_v11  ;;  %vm99_vm2 = vweird.f32 %v78_v11  ;;  %v103_v21 = vand.u32 2147483647, %v78_v11 }
  0x1b   :  { %v91_v23 = vor.u32 1.1754944e-38, %v90_v15  ;;  %vm89_vm5 = vcmp.eq.f32.partialorder %v88_v18, 8.507059e+37 }
  0x1c   :  { %v106_v26 = vor.u32 1.1754944e-38, %v105_v19  ;;  %vm104_vm7 = vcmp.eq.f32.partialorder %v103_v21, 8.507059e+37 }
  0x1f   :  { %v197_v12 = vpop.eup %196 }
  0x20   :  { %v199_v13 = vpop.eup %198  ;;  %v80_v14 = vmul.f32 %v197_v12, %v77_v10  ;;  %vm85_vm1 = vweird.f32 %v197_v12 }
  0x21   :  { %v95_v16 = vmul.f32 %v199_v13, %v78_v11  ;;  %vm100_vm3 = vweird.f32 %v199_v13  ;;  %vm86_vm4 = vmor %vm84_vm0, %vm85_vm1 }
  0x22   :  { %v81_v17 = vsub.f32 1.0, %v80_v14  ;;  %vm101_vm6 = vmor %vm99_vm2, %vm100_vm3 }
  0x23   :  { %v96_v20 = vsub.f32 1.0, %v95_v16 }
  0x24   :  { %v82_v22 = vmul.f32 %v197_v12, %v81_v17 }
  0x25   :  { %v97_v24 = vmul.f32 %v199_v13, %v96_v20 }
  0x26   :  { %v83_v25 = vadd.f32 %v197_v12, %v82_v22 }
  0x27   :  { %v98_v27 = vadd.f32 %v199_v13, %v97_v24 }
  0x28   :  { %v87_v28 = vsel %vm86_vm4, %v197_v12, %v83_v25 }
  0x29   :  { %v92_v29 = vsel %vm89_vm5, %v91_v23, %v87_v28  ;;  %v102_v30 = vsel %vm101_vm6, %v199_v13, %v98_v27 }
  0x2a   :  { %v107_v31 = vsel %vm104_vm7, %v106_v26, %v102_v30  ;;  %v113_v32 = vsel %vm111_vm8, %v92_v29, 0.0 }
  0x2b   :  { %v120_v33 = vadd.f32 %v107_v31, %v92_v29  ;;  %v114_v34 = vsel %vm112_vm9, %v107_v31, 0.0 }
  0x2c   :  { %v124_v35 = vadd.f32 %v114_v34, %v113_v32 }
  0x2d   :  { %122 = vst [vmem:[#allocation8] sm:$0xff] %v120_v33 }
  0x2e   :  { %126 = vst [vmem:[#allocation10] sm:$0xff] %v124_v35  ;;  %148 = dma.vmem_to_hbm [thread:$0]  %s144_s6, 128, %s146_s9, [#allocation9]  }
  0x2f   :  { %159 = dma.vmem_to_hbm [thread:$0]  %s155_s11, 128, %s157_s14, [#allocation9]  }
  0x30   :  { %324 = dma.done.wait [#allocation4], 128  }
  0x31   :  { %325 = vsyncadd [#allocation4], 4294967168 }
  0x32   :  { %326 = dma.done.wait [#allocation9], 256  }
  0x33   :  { %327 = vsyncadd [#allocation9], 4294967040 }
  0x34   :  { %172 = vsyncpa [#allocation3], 1 }
  0x35   :  { %173 = vsyncpa [#allocation6], 1 }
  0x36   :  { %174 = vsyncpa [#allocation4], 1 }
  0x37   :  { %175 = vsyncpa [#allocation9], 1 }

</bundles_post_ra>
